<compile_context>
chip_gen: v5e
topology: v5e:2x2
jax: 0.10.0
libtpu: 0.0.40
codegen_flags: <defaults>
</compile_context>

<pallas_src>
import functools
import math

import jax
import jax.numpy as jnp
import numpy as np
from jax.experimental import pallas as pl
from jax.experimental.pallas import tpu as pltpu


def _pick_tile(dim, candidates):
    """Largest candidate tile that evenly divides dim (else the full dim).

    Note: if no candidate divides `dim`, the full dimension becomes one block;
    fine for the small shapes here, but huge non-divisible dims should be
    padded by the caller.  # TODO(synk): pad ragged T/Tk instead of falling back.
    """
    for c in candidates:
        if dim > c and dim % c == 0:
            return c
    return dim


# ---------------------------------------------------------------------------
# Kernel 1: tiled Conv1D (GPT "transposed Linear"):  y = x @ W + b
# ---------------------------------------------------------------------------
def _conv1d_kernel(x_ref, w_ref, b_ref, o_ref, acc_ref, *, mxu_dtype):
    @pl.when(pl.program_id(2) == 0)
    def _():
        acc_ref[...] = jnp.zeros_like(acc_ref)

    acc_ref[...] += jnp.dot(x_ref[...].astype(mxu_dtype),
                            w_ref[...].astype(mxu_dtype),
                            preferred_element_type=jnp.float32)

    @pl.when(pl.program_id(2) == pl.num_programs(2) - 1)
    def _():
        o_ref[...] = (acc_ref[...] + b_ref[...].astype(jnp.float32)).astype(o_ref.dtype)


def conv1d(x2d, w, b, *, mxu_dtype=jnp.float32, out_dtype=None):
    """x2d: (M, K), w: (K, N), b: (N,) -> (M, N) in out_dtype."""
    M, K = x2d.shape
    N = w.shape[1]
    out_dtype = jnp.dtype(out_dtype) if out_dtype is not None else x2d.dtype
    tm = _pick_tile(M, (512, 256, 128))
    tn = _pick_tile(N, (512, 256, 128))
    tk = _pick_tile(K, (1024, 512, 256, 128))
    cost = pl.CostEstimate(
        flops=2 * M * K * N,
        transcendentals=0,
        bytes_accessed=(M * K * x2d.dtype.itemsize + K * N * w.dtype.itemsize
                        + N * b.dtype.itemsize + M * N * out_dtype.itemsize),
    )
    kern = functools.partial(_conv1d_kernel, mxu_dtype=mxu_dtype)
    return pl.pallas_call(
        kern,
        out_shape=jax.ShapeDtypeStruct((M, N), out_dtype),
        grid=(M // tm, N // tn, K // tk),
        in_specs=[
            pl.BlockSpec((tm, tk), lambda i, j, k: (i, k)),
            pl.BlockSpec((tk, tn), lambda i, j, k: (k, j)),
            pl.BlockSpec((1, tn), lambda i, j, k: (0, j)),
        ],
        out_specs=pl.BlockSpec((tm, tn), lambda i, j, k: (i, j)),
        scratch_shapes=[pltpu.VMEM((tm, tn), jnp.float32)],
        compiler_params=pltpu.CompilerParams(
            dimension_semantics=("parallel", "parallel", "arbitrary"),
            vmem_limit_bytes=56 * 1024 * 1024),
        cost_estimate=cost,
    )(x2d, w, b.reshape(1, N))


# ---------------------------------------------------------------------------
# Kernel 2: fused multi-head attention (flash-style, q- and kv-tiled, online
# softmax) with the c_proj matmul fused into the epilogue.
#   q comes from x (B,T,nx) directly; k/v are static lane slices of the
#   (B,Tk,2*nx) c_attn(kv-only) output; output is lane-dense (tq, nx).
# ---------------------------------------------------------------------------
def _attn_proj_kernel(x_ref, kv_ref, wp_ref, bp_ref, o_ref,
                      m_sc, l_sc, acc_sc, *,
                      n_head, head_dim, scale, mxu_dtype):
    kj = pl.program_id(2)

    @pl.when(kj == 0)
    def _():
        m_sc[...] = jnp.full_like(m_sc, -jnp.inf)
        l_sc[...] = jnp.zeros_like(l_sc)
        acc_sc[...] = jnp.zeros_like(acc_sc)

    nx = n_head * head_dim
    q = x_ref[0].astype(jnp.float32)          # (tq, nx) raw x is the query
    if scale:
        # fold 1/sqrt(hd) into q in f32 (cheaper than scaling (tq,tkv) scores)
        q = q * jnp.float32(1.0 / math.sqrt(head_dim))
    q = q.astype(mxu_dtype)

    kv = kv_ref[0]                            # (tkv, 2*nx)
    k = kv[:, :nx].astype(mxu_dtype)          # (tkv, nx)
    v = kv[:, nx:].astype(mxu_dtype)          # (tkv, nx)

    # static unroll over heads; all slices are static lane slices
    for h in range(n_head):
        lo, hi = h * head_dim, (h + 1) * head_dim

        # q @ k^T without materializing a transpose of k; f32 accumulation
        s = jax.lax.dot_general(
            q[:, lo:hi], k[:, lo:hi],
            dimension_numbers=(((1,), (1,)), ((), ())),
            preferred_element_type=jnp.float32)          # (tq, tkv) f32

        m_prev = m_sc[:, h:h + 1]                        # (tq, 1)
        m_new = jnp.maximum(m_prev, jnp.max(s, axis=-1, keepdims=True))
        alpha = jnp.exp(m_prev - m_new)
        p = jnp.exp(s - m_new)                           # (tq, tkv) f32

        l_sc[:, h:h + 1] = alpha * l_sc[:, h:h + 1] + jnp.sum(p, axis=-1, keepdims=True)
        acc_sc[:, lo:hi] = alpha * acc_sc[:, lo:hi] + jnp.dot(
            p.astype(mxu_dtype), v[:, lo:hi], preferred_element_type=jnp.float32)
        m_sc[:, h:h + 1] = m_new

    @pl.when(kj == pl.num_programs(2) - 1)
    def _():
        # exact normalization (no approx reciprocal), then fused c_proj epilogue
        for h in range(n_head):
            lo, hi = h * head_dim, (h + 1) * head_dim
            acc_sc[:, lo:hi] = acc_sc[:, lo:hi] * (1.0 / l_sc[:, h:h + 1])
        a = acc_sc[...].astype(mxu_dtype)                # (tq, nx) merged heads
        o = jnp.dot(a, wp_ref[...].astype(mxu_dtype),
                    preferred_element_type=jnp.float32)  # (tq, nx)
        o_ref[0] = (o + bp_ref[...].astype(jnp.float32)).astype(o_ref.dtype)


def fused_attention_proj(x, kv, w_proj, b_proj, *, n_head, scale,
                         mxu_dtype=jnp.float32):
    """x: (B,T,nx), kv: (B,Tk,2*nx), w_proj: (nx,nx), b_proj: (nx,) -> (B,T,nx)."""
    B, T, nx = x.shape
    Tk = kv.shape[1]
    hd = nx // n_head
    tq = _pick_tile(T, (256, 128))
    tkv = _pick_tile(Tk, (512, 256, 128))
    n_qt = T // tq

    kern = functools.partial(_attn_proj_kernel, n_head=n_head, head_dim=hd,
                             scale=scale, mxu_dtype=mxu_dtype)
    cost = pl.CostEstimate(
        flops=4 * B * T * Tk * nx + 2 * B * T * nx * nx,
        transcendentals=B * n_head * T * Tk,
        bytes_accessed=(B * T * nx * x.dtype.itemsize                     # q read
                        + n_qt * B * Tk * 2 * nx * kv.dtype.itemsize      # kv re-streamed per q tile
                        + nx * nx * w_proj.dtype.itemsize                 # resident weight
                        + B * T * nx * x.dtype.itemsize),                 # output write
    )
    return pl.pallas_call(
        kern,
        out_shape=jax.ShapeDtypeStruct((B, T, nx), x.dtype),
        grid=(B, T // tq, Tk // tkv),
        in_specs=[
            pl.BlockSpec((1, tq, nx), lambda b, qi, kj: (b, qi, 0)),
            pl.BlockSpec((1, tkv, 2 * nx), lambda b, qi, kj: (b, kj, 0)),
            pl.BlockSpec((nx, nx), lambda b, qi, kj: (0, 0)),     # VMEM-resident w_proj
            pl.BlockSpec((1, nx), lambda b, qi, kj: (0, 0)),      # VMEM-resident b_proj
        ],
        out_specs=pl.BlockSpec((1, tq, nx), lambda b, qi, kj: (b, qi, 0)),
        scratch_shapes=[
            pltpu.VMEM((tq, n_head), jnp.float32),   # running max (per head column)
            pltpu.VMEM((tq, n_head), jnp.float32),   # running sum (per head column)
            pltpu.VMEM((tq, nx), jnp.float32),       # lane-dense output accumulator
        ],
        compiler_params=pltpu.CompilerParams(
            dimension_semantics=("parallel", "parallel", "arbitrary"),
            vmem_limit_bytes=56 * 1024 * 1024),      # safe on v7x's 64 MiB VMEM
        cost_estimate=cost,
    )(x, kv, w_proj, b_proj.reshape(1, nx))


# ---------------------------------------------------------------------------
# Full forward
# ---------------------------------------------------------------------------
def attention_knowledge_forward(x, xk, params, *, n_head, scale,
                                mxu_dtype=jnp.bfloat16):
    B, T, nx = x.shape
    Tk = xk.shape[1]
    mxu_dtype = jnp.dtype(mxu_dtype)

    # c_attn: only the key+value two-thirds are ever used -> project just those.
    w_kv = params["w_attn"][:, nx:]                 # (nx, 2*nx)
    b_kv = params["b_attn"][nx:]                    # (2*nx,)
    w_proj = params["w_proj"]
    b_proj = params["b_proj"]

    if mxu_dtype == jnp.bfloat16:
        # bf16 weights halve HBM weight streaming; bf16 kv intermediate halves
        # the (B,Tk,2nx) HBM write+read.  All accumulation stays f32.
        w_kv = w_kv.astype(jnp.bfloat16)
        w_proj = w_proj.astype(jnp.bfloat16)
        kv_dtype = jnp.bfloat16
    else:
        kv_dtype = x.dtype

    kv = conv1d(xk.reshape(B * Tk, nx), w_kv, b_kv,
                mxu_dtype=mxu_dtype, out_dtype=kv_dtype).reshape(B, Tk, 2 * nx)

    # fused split_heads + flash attention + merge_heads + c_proj (+ identity dropout)
    return fused_attention_proj(x, kv, w_proj, b_proj,
                                n_head=n_head, scale=scale, mxu_dtype=mxu_dtype)
    # TODO(synk): attn_pdrop / resid_pdrop dropout and output_attentions path
    # omitted (identity / disabled in eval mode, matching the reference usage).


# Pure-JAX reference (mirrors the PyTorch module, including the unused query)
def reference_forward(x, xk, params, *, n_head, scale):
    B, T, nx = x.shape
    Tk = xk.shape[1]
    hd = nx // n_head
    proj = xk.reshape(-1, nx) @ params["w_attn"] + params["b_attn"]
    proj = proj.reshape(B, Tk, 3 * nx)
    _q_unused, key, value = jnp.split(proj, 3, axis=2)
    q = x.reshape(B, T, n_head, hd).transpose(0, 2, 1, 3)
    k = key.reshape(B, Tk, n_head, hd).transpose(0, 2, 3, 1)      # (B,H,hd,Tk)
    v = value.reshape(B, Tk, n_head, hd).transpose(0, 2, 1, 3)
    w = jnp.einsum("bhtd,bhdk->bhtk", q, k)
    if scale:
        w = w / math.sqrt(hd)
    w = jax.nn.softmax(w, axis=-1)
    a = jnp.einsum("bhtk,bhkd->bhtd", w, v)
    a = a.transpose(0, 2, 1, 3).reshape(B, T, nx)
    return (a.reshape(-1, nx) @ params["w_proj"] + params["b_proj"]).reshape(B, T, nx)


if __name__ == "__main__":
    # Small config consistent with the module (nx % n_head == 0)
    B, T, Tk, nx, n_head = 2, 8, 16, 32, 4
    scale = True

    key0 = jax.random.PRNGKey(0)
    kx, kxk, kw1, kw2 = jax.random.split(key0, 4)

    x = jax.random.normal(kx, (B, T, nx), dtype=jnp.float32)
    xk = jax.random.normal(kxk, (B, Tk, nx), dtype=jnp.float32)

    params = {
        "w_attn": 0.02 * jax.random.normal(kw1, (nx, 3 * nx), dtype=jnp.float32),
        "b_attn": 0.01 * jnp.arange(3 * nx, dtype=jnp.float32),   # non-zero bias path
        "w_proj": 0.02 * jax.random.normal(kw2, (nx, nx), dtype=jnp.float32),
        "b_proj": 0.01 * jnp.ones((nx,), dtype=jnp.float32),
    }

    ref = reference_forward(x, xk, params, n_head=n_head, scale=scale)

    # 1) exact path: f32 MXU operands, tight check against the reference
    fwd_f32 = jax.jit(functools.partial(attention_knowledge_forward,
                                        n_head=n_head, scale=scale,
                                        mxu_dtype=jnp.float32))
    out_f32 = jax.block_until_ready(fwd_f32(x, xk, params))
    np.testing.assert_allclose(np.asarray(out_f32), np.asarray(ref),
                               rtol=1e-2, atol=5e-4)

    # 2) fast path: bf16 MXU operands / f32 accumulation, looser tolerance
    fwd_bf16 = jax.jit(functools.partial(attention_knowledge_forward,
                                         n_head=n_head, scale=scale,
                                         mxu_dtype=jnp.bfloat16))
    out_bf16 = jax.block_until_ready(fwd_bf16(x, xk, params))
    np.testing.assert_allclose(np.asarray(out_bf16), np.asarray(ref),
                               rtol=5e-2, atol=5e-3)

    print("KERNEL_OK")
</pallas_src>

<mosaic_0001>
module attributes {stable_mosaic.version = 11 : i64} {
  func.func @_attn_proj_kernel(%arg0: i32, %arg1: i32, %arg2: i32, %arg3: memref<1x8x32xf32, #tpu.memory_space<vmem>>, %arg4: memref<1x16x64xf32, #tpu.memory_space<vmem>>, %arg5: memref<32x32xf32, #tpu.memory_space<vmem>>, %arg6: memref<1x32xf32, #tpu.memory_space<vmem>>, %arg7: memref<1x8x32xf32, #tpu.memory_space<vmem>>, %arg8: memref<8x4xf32, #tpu.memory_space<vmem>>, %arg9: memref<8x4xf32, #tpu.memory_space<vmem>>, %arg10: memref<8x32xf32, #tpu.memory_space<vmem>>) attributes {dimension_semantics = [#tpu.dimension_semantics<parallel>, #tpu.dimension_semantics<parallel>, #tpu.dimension_semantics<arbitrary>], iteration_bounds = array<i64: 2, 1, 1>, scalar_prefetch = 0 : i64, scratch_operands = 3 : i64, tpu.core_type = #tpu.core_type<tc>, window_params = [{transform_indices = @transform_0, window_bounds = array<i64: 1, 8, 32>}, {transform_indices = @transform_1, window_bounds = array<i64: 1, 16, 64>}, {pipeline_mode = #tpu.pipeline_mode<synchronous>, transform_indices = @transform_2, window_bounds = array<i64: 32, 32>}, {pipeline_mode = #tpu.pipeline_mode<synchronous>, transform_indices = @transform_3, window_bounds = array<i64: 1, 32>}, {transform_indices = @transform_4, window_bounds = array<i64: 1, 8, 32>}]} {
    %c0_i32 = arith.constant 0 : i32
    %0 = arith.cmpi eq, %arg2, %c0_i32 : i32
    %1 = arith.extui %0 : i1 to i32
    %c0_i32_0 = arith.constant 0 : i32
    %2 = arith.cmpi ne, %1, %c0_i32_0 : i32
    scf.if %2 {
      %cst_66 = arith.constant 0xFF800000 : f32
      %118 = vector.broadcast %cst_66 : f32 to vector<8x4xf32>
      %c0_67 = arith.constant 0 : index
      %c0_68 = arith.constant 0 : index
      %119 = vector.load %arg8[%c0_67, %c0_68] : memref<8x4xf32, #tpu.memory_space<vmem>>, vector<8x4xf32>
      tpu.vector_store %arg8[%c0_67, %c0_68], %118 {strides = array<i32>} : memref<8x4xf32, #tpu.memory_space<vmem>>, vector<8x4xf32>,
      %cst_69 = arith.constant 0.000000e+00 : f32
      %120 = vector.broadcast %cst_69 : f32 to vector<8x4xf32>
      %c0_70 = arith.constant 0 : index
      %c0_71 = arith.constant 0 : index
      %121 = vector.load %arg9[%c0_70, %c0_71] : memref<8x4xf32, #tpu.memory_space<vmem>>, vector<8x4xf32>
      tpu.vector_store %arg9[%c0_70, %c0_71], %120 {strides = array<i32>} : memref<8x4xf32, #tpu.memory_space<vmem>>, vector<8x4xf32>,
      %cst_72 = arith.constant 0.000000e+00 : f32
      %122 = vector.broadcast %cst_72 : f32 to vector<8x32xf32>
      %c0_73 = arith.constant 0 : index
      %c0_74 = arith.constant 0 : index
      %123 = vector.load %arg10[%c0_73, %c0_74] : memref<8x32xf32, #tpu.memory_space<vmem>>, vector<8x32xf32>
      tpu.vector_store %arg10[%c0_73, %c0_74], %122 {strides = array<i32>} : memref<8x32xf32, #tpu.memory_space<vmem>>, vector<8x32xf32>,
    } else {
    }
    %c0 = arith.constant 0 : index
    %c0_1 = arith.constant 0 : index
    %c0_2 = arith.constant 0 : index
    %3 = vector.load %arg3[%c0, %c0_1, %c0_2] : memref<1x8x32xf32, #tpu.memory_space<vmem>>, vector<1x8x32xf32>
    %4 = vector.shape_cast %3 : vector<1x8x32xf32> to vector<8x32xf32>
    %cst = arith.constant 0.353553385 : f32
    %5 = vector.broadcast %cst : f32 to vector<8x32xf32>
    %6 = arith.mulf %4, %5 : vector<8x32xf32>
    %c0_3 = arith.constant 0 : index
    %c0_4 = arith.constant 0 : index
    %c0_5 = arith.constant 0 : index
    %7 = vector.load %arg4[%c0_3, %c0_4, %c0_5] : memref<1x16x64xf32, #tpu.memory_space<vmem>>, vector<1x16x64xf32>
    %8 = vector.shape_cast %7 : vector<1x16x64xf32> to vector<16x64xf32>
    %9 = vector.extract_strided_slice %8 {offsets = [0, 0], sizes = [16, 32], strides = [1, 1]} : vector<16x64xf32> to vector<16x32xf32>
    %10 = vector.extract_strided_slice %8 {offsets = [0, 32], sizes = [16, 32], strides = [1, 1]} : vector<16x64xf32> to vector<16x32xf32>
    %11 = vector.extract_strided_slice %6 {offsets = [0, 0], sizes = [8, 8], strides = [1, 1]} : vector<8x32xf32> to vector<8x8xf32>
    %12 = vector.extract_strided_slice %9 {offsets = [0, 0], sizes = [16, 8], strides = [1, 1]} : vector<16x32xf32> to vector<16x8xf32>
    %cst_6 = arith.constant dense<0.000000e+00> : vector<8x16xf32>
    %13 = tpu.matmul %11, %12, %cst_6 {dimension_numbers = #tpu.dot_dimension_numbers<[1], [1], [0], [0], [0, 0, 1, 0], [], []>} : vector<8x8xf32>, vector<16x8xf32>, vector<8x16xf32> -> vector<8x16xf32>
    %c0_7 = arith.constant 0 : index
    %c0_8 = arith.constant 0 : index
    %14 = vector.load %arg8[%c0_7, %c0_8] : memref<8x4xf32, #tpu.memory_space<vmem>>, vector<8x1xf32>
    %cst_9 = arith.constant dense<0xFF800000> : vector<8xf32>
    %15 = vector.multi_reduction <maximumf>, %13, %cst_9 [1] : vector<8x16xf32> to vector<8xf32>
    %16 = vector.shape_cast %15 : vector<8xf32> to vector<8x1xf32>
    %17 = arith.maximumf %14, %16 : vector<8x1xf32>
    %18 = arith.subf %14, %17 : vector<8x1xf32>
    %19 = math.exp %18 : vector<8x1xf32>
    %20 = vector.broadcast %17 : vector<8x1xf32> to vector<8x16xf32>
    %21 = arith.subf %13, %20 : vector<8x16xf32>
    %22 = math.exp %21 : vector<8x16xf32>
    %c0_10 = arith.constant 0 : index
    %c0_11 = arith.constant 0 : index
    %23 = vector.load %arg9[%c0_10, %c0_11] : memref<8x4xf32, #tpu.memory_space<vmem>>, vector<8x1xf32>
    %24 = arith.mulf %19, %23 : vector<8x1xf32>
    %cst_12 = arith.constant dense<0.000000e+00> : vector<8xf32>
    %25 = vector.multi_reduction <add>, %22, %cst_12 [1] : vector<8x16xf32> to vector<8xf32>
    %26 = vector.shape_cast %25 : vector<8xf32> to vector<8x1xf32>
    %27 = arith.addf %24, %26 : vector<8x1xf32>
    %c0_13 = arith.constant 0 : index
    %c0_14 = arith.constant 0 : index
    %28 = vector.load %arg9[%c0_13, %c0_14] : memref<8x4xf32, #tpu.memory_space<vmem>>, vector<8x1xf32>
    tpu.vector_store %arg9[%c0_13, %c0_14], %27 {strides = array<i32>} : memref<8x4xf32, #tpu.memory_space<vmem>>, vector<8x1xf32>,
    %c0_15 = arith.constant 0 : index
    %c0_16 = arith.constant 0 : index
    %29 = vector.load %arg10[%c0_15, %c0_16] : memref<8x32xf32, #tpu.memory_space<vmem>>, vector<8x8xf32>
    %30 = vector.broadcast %19 : vector<8x1xf32> to vector<8x8xf32>
    %31 = arith.mulf %30, %29 : vector<8x8xf32>
    %32 = vector.extract_strided_slice %10 {offsets = [0, 0], sizes = [16, 8], strides = [1, 1]} : vector<16x32xf32> to vector<16x8xf32>
    %cst_17 = arith.constant dense<0.000000e+00> : vector<8x8xf32>
    %33 = tpu.matmul %22, %32, %cst_17 {dimension_numbers = #tpu.dot_dimension_numbers<[1], [0], [0], [1], [0, 0, 1, 1], [], []>} : vector<8x16xf32>, vector<16x8xf32>, vector<8x8xf32> -> vector<8x8xf32>
    %34 = arith.addf %31, %33 : vector<8x8xf32>
    %c0_18 = arith.constant 0 : index
    %c0_19 = arith.constant 0 : index
    %35 = vector.load %arg10[%c0_18, %c0_19] : memref<8x32xf32, #tpu.memory_space<vmem>>, vector<8x8xf32>
    tpu.vector_store %arg10[%c0_18, %c0_19], %34 {strides = array<i32>} : memref<8x32xf32, #tpu.memory_space<vmem>>, vector<8x8xf32>,
    %c0_20 = arith.constant 0 : index
    %c0_21 = arith.constant 0 : index
    %36 = vector.load %arg8[%c0_20, %c0_21] : memref<8x4xf32, #tpu.memory_space<vmem>>, vector<8x1xf32>
    tpu.vector_store %arg8[%c0_20, %c0_21], %17 {strides = array<i32>} : memref<8x4xf32, #tpu.memory_space<vmem>>, vector<8x1xf32>,
    %37 = vector.extract_strided_slice %6 {offsets = [0, 8], sizes = [8, 8], strides = [1, 1]} : vector<8x32xf32> to vector<8x8xf32>
    %38 = vector.extract_strided_slice %9 {offsets = [0, 8], sizes = [16, 8], strides = [1, 1]} : vector<16x32xf32> to vector<16x8xf32>
    %cst_22 = arith.constant dense<0.000000e+00> : vector<8x16xf32>
    %39 = tpu.matmul %37, %38, %cst_22 {dimension_numbers = #tpu.dot_dimension_numbers<[1], [1], [0], [0], [0, 0, 1, 0], [], []>} : vector<8x8xf32>, vector<16x8xf32>, vector<8x16xf32> -> vector<8x16xf32>
    %c0_23 = arith.constant 0 : index
    %c1 = arith.constant 1 : index
    %40 = vector.load %arg8[%c0_23, %c1] : memref<8x4xf32, #tpu.memory_space<vmem>>, vector<8x1xf32>
    %cst_24 = arith.constant dense<0xFF800000> : vector<8xf32>
    %41 = vector.multi_reduction <maximumf>, %39, %cst_24 [1] : vector<8x16xf32> to vector<8xf32>
    %42 = vector.shape_cast %41 : vector<8xf32> to vector<8x1xf32>
    %43 = arith.maximumf %40, %42 : vector<8x1xf32>
    %44 = arith.subf %40, %43 : vector<8x1xf32>
    %45 = math.exp %44 : vector<8x1xf32>
    %46 = vector.broadcast %43 : vector<8x1xf32> to vector<8x16xf32>
    %47 = arith.subf %39, %46 : vector<8x16xf32>
    %48 = math.exp %47 : vector<8x16xf32>
    %c0_25 = arith.constant 0 : index
    %c1_26 = arith.constant 1 : index
    %49 = vector.load %arg9[%c0_25, %c1_26] : memref<8x4xf32, #tpu.memory_space<vmem>>, vector<8x1xf32>
    %50 = arith.mulf %45, %49 : vector<8x1xf32>
    %cst_27 = arith.constant dense<0.000000e+00> : vector<8xf32>
    %51 = vector.multi_reduction <add>, %48, %cst_27 [1] : vector<8x16xf32> to vector<8xf32>
    %52 = vector.shape_cast %51 : vector<8xf32> to vector<8x1xf32>
    %53 = arith.addf %50, %52 : vector<8x1xf32>
    %c0_28 = arith.constant 0 : index
    %c1_29 = arith.constant 1 : index
    %54 = vector.load %arg9[%c0_28, %c1_29] : memref<8x4xf32, #tpu.memory_space<vmem>>, vector<8x1xf32>
    tpu.vector_store %arg9[%c0_28, %c1_29], %53 {strides = array<i32>} : memref<8x4xf32, #tpu.memory_space<vmem>>, vector<8x1xf32>,
    %c0_30 = arith.constant 0 : index
    %c8 = arith.constant 8 : index
    %55 = vector.load %arg10[%c0_30, %c8] : memref<8x32xf32, #tpu.memory_space<vmem>>, vector<8x8xf32>
    %56 = vector.broadcast %45 : vector<8x1xf32> to vector<8x8xf32>
    %57 = arith.mulf %56, %55 : vector<8x8xf32>
    %58 = vector.extract_strided_slice %10 {offsets = [0, 8], sizes = [16, 8], strides = [1, 1]} : vector<16x32xf32> to vector<16x8xf32>
    %cst_31 = arith.constant dense<0.000000e+00> : vector<8x8xf32>
    %59 = tpu.matmul %48, %58, %cst_31 {dimension_numbers = #tpu.dot_dimension_numbers<[1], [0], [0], [1], [0, 0, 1, 1], [], []>} : vector<8x16xf32>, vector<16x8xf32>, vector<8x8xf32> -> vector<8x8xf32>
    %60 = arith.addf %57, %59 : vector<8x8xf32>
    %c0_32 = arith.constant 0 : index
    %c8_33 = arith.constant 8 : index
    %61 = vector.load %arg10[%c0_32, %c8_33] : memref<8x32xf32, #tpu.memory_space<vmem>>, vector<8x8xf32>
    tpu.vector_store %arg10[%c0_32, %c8_33], %60 {strides = array<i32>} : memref<8x32xf32, #tpu.memory_space<vmem>>, vector<8x8xf32>,
    %c0_34 = arith.constant 0 : index
    %c1_35 = arith.constant 1 : index
    %62 = vector.load %arg8[%c0_34, %c1_35] : memref<8x4xf32, #tpu.memory_space<vmem>>, vector<8x1xf32>
    tpu.vector_store %arg8[%c0_34, %c1_35], %43 {strides = array<i32>} : memref<8x4xf32, #tpu.memory_space<vmem>>, vector<8x1xf32>,
    %63 = vector.extract_strided_slice %6 {offsets = [0, 16], sizes = [8, 8], strides = [1, 1]} : vector<8x32xf32> to vector<8x8xf32>
    %64 = vector.extract_strided_slice %9 {offsets = [0, 16], sizes = [16, 8], strides = [1, 1]} : vector<16x32xf32> to vector<16x8xf32>
    %cst_36 = arith.constant dense<0.000000e+00> : vector<8x16xf32>
    %65 = tpu.matmul %63, %64, %cst_36 {dimension_numbers = #tpu.dot_dimension_numbers<[1], [1], [0], [0], [0, 0, 1, 0], [], []>} : vector<8x8xf32>, vector<16x8xf32>, vector<8x16xf32> -> vector<8x16xf32>
    %c0_37 = arith.constant 0 : index
    %c2 = arith.constant 2 : index
    %66 = vector.load %arg8[%c0_37, %c2] : memref<8x4xf32, #tpu.memory_space<vmem>>, vector<8x1xf32>
    %cst_38 = arith.constant dense<0xFF800000> : vector<8xf32>
    %67 = vector.multi_reduction <maximumf>, %65, %cst_38 [1] : vector<8x16xf32> to vector<8xf32>
    %68 = vector.shape_cast %67 : vector<8xf32> to vector<8x1xf32>
    %69 = arith.maximumf %66, %68 : vector<8x1xf32>
    %70 = arith.subf %66, %69 : vector<8x1xf32>
    %71 = math.exp %70 : vector<8x1xf32>
    %72 = vector.broadcast %69 : vector<8x1xf32> to vector<8x16xf32>
    %73 = arith.subf %65, %72 : vector<8x16xf32>
    %74 = math.exp %73 : vector<8x16xf32>
    %c0_39 = arith.constant 0 : index
    %c2_40 = arith.constant 2 : index
    %75 = vector.load %arg9[%c0_39, %c2_40] : memref<8x4xf32, #tpu.memory_space<vmem>>, vector<8x1xf32>
    %76 = arith.mulf %71, %75 : vector<8x1xf32>
    %cst_41 = arith.constant dense<0.000000e+00> : vector<8xf32>
    %77 = vector.multi_reduction <add>, %74, %cst_41 [1] : vector<8x16xf32> to vector<8xf32>
    %78 = vector.shape_cast %77 : vector<8xf32> to vector<8x1xf32>
    %79 = arith.addf %76, %78 : vector<8x1xf32>
    %c0_42 = arith.constant 0 : index
    %c2_43 = arith.constant 2 : index
    %80 = vector.load %arg9[%c0_42, %c2_43] : memref<8x4xf32, #tpu.memory_space<vmem>>, vector<8x1xf32>
    tpu.vector_store %arg9[%c0_42, %c2_43], %79 {strides = array<i32>} : memref<8x4xf32, #tpu.memory_space<vmem>>, vector<8x1xf32>,
    %c0_44 = arith.constant 0 : index
    %c16 = arith.constant 16 : index
    %81 = vector.load %arg10[%c0_44, %c16] : memref<8x32xf32, #tpu.memory_space<vmem>>, vector<8x8xf32>
    %82 = vector.broadcast %71 : vector<8x1xf32> to vector<8x8xf32>
    %83 = arith.mulf %82, %81 : vector<8x8xf32>
    %84 = vector.extract_strided_slice %10 {offsets = [0, 16], sizes = [16, 8], strides = [1, 1]} : vector<16x32xf32> to vector<16x8xf32>
    %cst_45 = arith.constant dense<0.000000e+00> : vector<8x8xf32>
    %85 = tpu.matmul %74, %84, %cst_45 {dimension_numbers = #tpu.dot_dimension_numbers<[1], [0], [0], [1], [0, 0, 1, 1], [], []>} : vector<8x16xf32>, vector<16x8xf32>, vector<8x8xf32> -> vector<8x8xf32>
    %86 = arith.addf %83, %85 : vector<8x8xf32>
    %c0_46 = arith.constant 0 : index
    %c16_47 = arith.constant 16 : index
    %87 = vector.load %arg10[%c0_46, %c16_47] : memref<8x32xf32, #tpu.memory_space<vmem>>, vector<8x8xf32>
    tpu.vector_store %arg10[%c0_46, %c16_47], %86 {strides = array<i32>} : memref<8x32xf32, #tpu.memory_space<vmem>>, vector<8x8xf32>,
    %c0_48 = arith.constant 0 : index
    %c2_49 = arith.constant 2 : index
    %88 = vector.load %arg8[%c0_48, %c2_49] : memref<8x4xf32, #tpu.memory_space<vmem>>, vector<8x1xf32>
    tpu.vector_store %arg8[%c0_48, %c2_49], %69 {strides = array<i32>} : memref<8x4xf32, #tpu.memory_space<vmem>>, vector<8x1xf32>,
    %89 = vector.extract_strided_slice %6 {offsets = [0, 24], sizes = [8, 8], strides = [1, 1]} : vector<8x32xf32> to vector<8x8xf32>
    %90 = vector.extract_strided_slice %9 {offsets = [0, 24], sizes = [16, 8], strides = [1, 1]} : vector<16x32xf32> to vector<16x8xf32>
    %cst_50 = arith.constant dense<0.000000e+00> : vector<8x16xf32>
    %91 = tpu.matmul %89, %90, %cst_50 {dimension_numbers = #tpu.dot_dimension_numbers<[1], [1], [0], [0], [0, 0, 1, 0], [], []>} : vector<8x8xf32>, vector<16x8xf32>, vector<8x16xf32> -> vector<8x16xf32>
    %c0_51 = arith.constant 0 : index
    %c3 = arith.constant 3 : index
    %92 = vector.load %arg8[%c0_51, %c3] : memref<8x4xf32, #tpu.memory_space<vmem>>, vector<8x1xf32>
    %cst_52 = arith.constant dense<0xFF800000> : vector<8xf32>
    %93 = vector.multi_reduction <maximumf>, %91, %cst_52 [1] : vector<8x16xf32> to vector<8xf32>
    %94 = vector.shape_cast %93 : vector<8xf32> to vector<8x1xf32>
    %95 = arith.maximumf %92, %94 : vector<8x1xf32>
    %96 = arith.subf %92, %95 : vector<8x1xf32>
    %97 = math.exp %96 : vector<8x1xf32>
    %98 = vector.broadcast %95 : vector<8x1xf32> to vector<8x16xf32>
    %99 = arith.subf %91, %98 : vector<8x16xf32>
    %100 = math.exp %99 : vector<8x16xf32>
    %c0_53 = arith.constant 0 : index
    %c3_54 = arith.constant 3 : index
    %101 = vector.load %arg9[%c0_53, %c3_54] : memref<8x4xf32, #tpu.memory_space<vmem>>, vector<8x1xf32>
    %102 = arith.mulf %97, %101 : vector<8x1xf32>
    %cst_55 = arith.constant dense<0.000000e+00> : vector<8xf32>
    %103 = vector.multi_reduction <add>, %100, %cst_55 [1] : vector<8x16xf32> to vector<8xf32>
    %104 = vector.shape_cast %103 : vector<8xf32> to vector<8x1xf32>
    %105 = arith.addf %102, %104 : vector<8x1xf32>
    %c0_56 = arith.constant 0 : index
    %c3_57 = arith.constant 3 : index
    %106 = vector.load %arg9[%c0_56, %c3_57] : memref<8x4xf32, #tpu.memory_space<vmem>>, vector<8x1xf32>
    tpu.vector_store %arg9[%c0_56, %c3_57], %105 {strides = array<i32>} : memref<8x4xf32, #tpu.memory_space<vmem>>, vector<8x1xf32>,
    %c0_58 = arith.constant 0 : index
    %c24 = arith.constant 24 : index
    %107 = vector.load %arg10[%c0_58, %c24] : memref<8x32xf32, #tpu.memory_space<vmem>>, vector<8x8xf32>
    %108 = vector.broadcast %97 : vector<8x1xf32> to vector<8x8xf32>
    %109 = arith.mulf %108, %107 : vector<8x8xf32>
    %110 = vector.extract_strided_slice %10 {offsets = [0, 24], sizes = [16, 8], strides = [1, 1]} : vector<16x32xf32> to vector<16x8xf32>
    %cst_59 = arith.constant dense<0.000000e+00> : vector<8x8xf32>
    %111 = tpu.matmul %100, %110, %cst_59 {dimension_numbers = #tpu.dot_dimension_numbers<[1], [0], [0], [1], [0, 0, 1, 1], [], []>} : vector<8x16xf32>, vector<16x8xf32>, vector<8x8xf32> -> vector<8x8xf32>
    %112 = arith.addf %109, %111 : vector<8x8xf32>
    %c0_60 = arith.constant 0 : index
    %c24_61 = arith.constant 24 : index
    %113 = vector.load %arg10[%c0_60, %c24_61] : memref<8x32xf32, #tpu.memory_space<vmem>>, vector<8x8xf32>
    tpu.vector_store %arg10[%c0_60, %c24_61], %112 {strides = array<i32>} : memref<8x32xf32, #tpu.memory_space<vmem>>, vector<8x8xf32>,
    %c0_62 = arith.constant 0 : index
    %c3_63 = arith.constant 3 : index
    %114 = vector.load %arg8[%c0_62, %c3_63] : memref<8x4xf32, #tpu.memory_space<vmem>>, vector<8x1xf32>
    tpu.vector_store %arg8[%c0_62, %c3_63], %95 {strides = array<i32>} : memref<8x4xf32, #tpu.memory_space<vmem>>, vector<8x1xf32>,
    %c0_i32_64 = arith.constant 0 : i32
    %115 = arith.cmpi eq, %arg2, %c0_i32_64 : i32
    %116 = arith.extui %115 : i1 to i32
    %c0_i32_65 = arith.constant 0 : i32
    %117 = arith.cmpi ne, %116, %c0_i32_65 : i32
    scf.if %117 {
      %c0_66 = arith.constant 0 : index
      %c0_67 = arith.constant 0 : index
      %118 = vector.load %arg10[%c0_66, %c0_67] : memref<8x32xf32, #tpu.memory_space<vmem>>, vector<8x8xf32>
      %c0_68 = arith.constant 0 : index
      %c0_69 = arith.constant 0 : index
      %119 = vector.load %arg9[%c0_68, %c0_69] : memref<8x4xf32, #tpu.memory_space<vmem>>, vector<8x1xf32>
      %cst_70 = arith.constant 1.000000e+00 : f32
      %120 = vector.broadcast %cst_70 : f32 to vector<8x1xf32>
      %121 = arith.divf %120, %119 : vector<8x1xf32>
      %122 = vector.broadcast %121 : vector<8x1xf32> to vector<8x8xf32>
      %123 = arith.mulf %118, %122 : vector<8x8xf32>
      %c0_71 = arith.constant 0 : index
      %c0_72 = arith.constant 0 : index
      %124 = vector.load %arg10[%c0_71, %c0_72] : memref<8x32xf32, #tpu.memory_space<vmem>>, vector<8x8xf32>
      tpu.vector_store %arg10[%c0_71, %c0_72], %123 {strides = array<i32>} : memref<8x32xf32, #tpu.memory_space<vmem>>, vector<8x8xf32>,
      %c0_73 = arith.constant 0 : index
      %c8_74 = arith.constant 8 : index
      %125 = vector.load %arg10[%c0_73, %c8_74] : memref<8x32xf32, #tpu.memory_space<vmem>>, vector<8x8xf32>
      %c0_75 = arith.constant 0 : index
      %c1_76 = arith.constant 1 : index
      %126 = vector.load %arg9[%c0_75, %c1_76] : memref<8x4xf32, #tpu.memory_space<vmem>>, vector<8x1xf32>
      %cst_77 = arith.constant 1.000000e+00 : f32
      %127 = vector.broadcast %cst_77 : f32 to vector<8x1xf32>
      %128 = arith.divf %127, %126 : vector<8x1xf32>
      %129 = vector.broadcast %128 : vector<8x1xf32> to vector<8x8xf32>
      %130 = arith.mulf %125, %129 : vector<8x8xf32>
      %c0_78 = arith.constant 0 : index
      %c8_79 = arith.constant 8 : index
      %131 = vector.load %arg10[%c0_78, %c8_79] : memref<8x32xf32, #tpu.memory_space<vmem>>, vector<8x8xf32>
      tpu.vector_store %arg10[%c0_78, %c8_79], %130 {strides = array<i32>} : memref<8x32xf32, #tpu.memory_space<vmem>>, vector<8x8xf32>,
      %c0_80 = arith.constant 0 : index
      %c16_81 = arith.constant 16 : index
      %132 = vector.load %arg10[%c0_80, %c16_81] : memref<8x32xf32, #tpu.memory_space<vmem>>, vector<8x8xf32>
      %c0_82 = arith.constant 0 : index
      %c2_83 = arith.constant 2 : index
      %133 = vector.load %arg9[%c0_82, %c2_83] : memref<8x4xf32, #tpu.memory_space<vmem>>, vector<8x1xf32>
      %cst_84 = arith.constant 1.000000e+00 : f32
      %134 = vector.broadcast %cst_84 : f32 to vector<8x1xf32>
      %135 = arith.divf %134, %133 : vector<8x1xf32>
      %136 = vector.broadcast %135 : vector<8x1xf32> to vector<8x8xf32>
      %137 = arith.mulf %132, %136 : vector<8x8xf32>
      %c0_85 = arith.constant 0 : index
      %c16_86 = arith.constant 16 : index
      %138 = vector.load %arg10[%c0_85, %c16_86] : memref<8x32xf32, #tpu.memory_space<vmem>>, vector<8x8xf32>
      tpu.vector_store %arg10[%c0_85, %c16_86], %137 {strides = array<i32>} : memref<8x32xf32, #tpu.memory_space<vmem>>, vector<8x8xf32>,
      %c0_87 = arith.constant 0 : index
      %c24_88 = arith.constant 24 : index
      %139 = vector.load %arg10[%c0_87, %c24_88] : memref<8x32xf32, #tpu.memory_space<vmem>>, vector<8x8xf32>
      %c0_89 = arith.constant 0 : index
      %c3_90 = arith.constant 3 : index
      %140 = vector.load %arg9[%c0_89, %c3_90] : memref<8x4xf32, #tpu.memory_space<vmem>>, vector<8x1xf32>
      %cst_91 = arith.constant 1.000000e+00 : f32
      %141 = vector.broadcast %cst_91 : f32 to vector<8x1xf32>
      %142 = arith.divf %141, %140 : vector<8x1xf32>
      %143 = vector.broadcast %142 : vector<8x1xf32> to vector<8x8xf32>
      %144 = arith.mulf %139, %143 : vector<8x8xf32>
      %c0_92 = arith.constant 0 : index
      %c24_93 = arith.constant 24 : index
      %145 = vector.load %arg10[%c0_92, %c24_93] : memref<8x32xf32, #tpu.memory_space<vmem>>, vector<8x8xf32>
      tpu.vector_store %arg10[%c0_92, %c24_93], %144 {strides = array<i32>} : memref<8x32xf32, #tpu.memory_space<vmem>>, vector<8x8xf32>,
      %c0_94 = arith.constant 0 : index
      %c0_95 = arith.constant 0 : index
      %146 = vector.load %arg10[%c0_94, %c0_95] : memref<8x32xf32, #tpu.memory_space<vmem>>, vector<8x32xf32>
      %c0_96 = arith.constant 0 : index
      %c0_97 = arith.constant 0 : index
      %147 = vector.load %arg5[%c0_96, %c0_97] : memref<32x32xf32, #tpu.memory_space<vmem>>, vector<32x32xf32>
      %cst_98 = arith.constant dense<0.000000e+00> : vector<8x32xf32>
      %148 = tpu.matmul %146, %147, %cst_98 {dimension_numbers = #tpu.dot_dimension_numbers<[1], [0], [0], [1], [0, 0, 1, 1], [], []>} : vector<8x32xf32>, vector<32x32xf32>, vector<8x32xf32> -> vector<8x32xf32>
      %c0_99 = arith.constant 0 : index
      %c0_100 = arith.constant 0 : index
      %149 = vector.load %arg6[%c0_99, %c0_100] : memref<1x32xf32, #tpu.memory_space<vmem>>, vector<1x32xf32>
      %150 = vector.broadcast %149 : vector<1x32xf32> to vector<8x32xf32>
      %151 = arith.addf %148, %150 : vector<8x32xf32>
      %c0_101 = arith.constant 0 : index
      %c0_102 = arith.constant 0 : index
      %c0_103 = arith.constant 0 : index
      %152 = vector.load %arg7[%c0_101, %c0_102, %c0_103] : memref<1x8x32xf32, #tpu.memory_space<vmem>>, vector<1x8x32xf32>
      %153 = vector.shape_cast %152 : vector<1x8x32xf32> to vector<8x32xf32>
      %154 = vector.shape_cast %151 : vector<8x32xf32> to vector<1x8x32xf32>
      tpu.vector_store %arg7[%c0_101, %c0_102, %c0_103], %154 {strides = array<i32>} : memref<1x8x32xf32, #tpu.memory_space<vmem>>, vector<1x8x32xf32>,
    } else {
    }
    return
  }
  func.func @transform_0(%arg0: i32, %arg1: i32, %arg2: i32) -> (i32, i32, i32) {
    %c0_i32 = arith.constant 0 : i32
    %c0_i32_0 = arith.constant 0 : i32
    return %arg0, %arg1, %c0_i32 : i32, i32, i32
  }
  func.func @transform_1(%arg0: i32, %arg1: i32, %arg2: i32) -> (i32, i32, i32) {
    %c0_i32 = arith.constant 0 : i32
    %c0_i32_0 = arith.constant 0 : i32
    return %arg0, %arg2, %c0_i32 : i32, i32, i32
  }
  func.func @transform_2(%arg0: i32, %arg1: i32, %arg2: i32) -> (i32, i32) {
    %c0_i32 = arith.constant 0 : i32
    %c0_i32_0 = arith.constant 0 : i32
    %c0_i32_1 = arith.constant 0 : i32
    return %c0_i32, %c0_i32_0 : i32, i32
  }
  func.func @transform_3(%arg0: i32, %arg1: i32, %arg2: i32) -> (i32, i32) {
    %c0_i32 = arith.constant 0 : i32
    %c0_i32_0 = arith.constant 0 : i32
    %c0_i32_1 = arith.constant 0 : i32
    return %c0_i32, %c0_i32_0 : i32, i32
  }
  func.func @transform_4(%arg0: i32, %arg1: i32, %arg2: i32) -> (i32, i32, i32) {
    %c0_i32 = arith.constant 0 : i32
    %c0_i32_0 = arith.constant 0 : i32
    return %arg0, %arg1, %c0_i32 : i32, i32, i32
  }
}

module attributes {stable_mosaic.version = 11 : i64} {
  func.func @_conv1d_kernel(%arg0: i32, %arg1: i32, %arg2: i32, %arg3: memref<32x32xf32, #tpu.memory_space<vmem>>, %arg4: memref<32x64xf32, #tpu.memory_space<vmem>>, %arg5: memref<1x64xf32, #tpu.memory_space<vmem>>, %arg6: memref<32x64xf32, #tpu.memory_space<vmem>>, %arg7: memref<32x64xf32, #tpu.memory_space<vmem>>) attributes {dimension_semantics = [#tpu.dimension_semantics<parallel>, #tpu.dimension_semantics<parallel>, #tpu.dimension_semantics<arbitrary>], iteration_bounds = array<i64: 1, 1, 1>, scalar_prefetch = 0 : i64, scratch_operands = 1 : i64, tpu.core_type = #tpu.core_type<tc>, window_params = [{transform_indices = @transform_0, window_bounds = array<i64: 32, 32>}, {transform_indices = @transform_1, window_bounds = array<i64: 32, 64>}, {transform_indices = @transform_2, window_bounds = array<i64: 1, 64>}, {transform_indices = @transform_3, window_bounds = array<i64: 32, 64>}]} {
    %c0_i32 = arith.constant 0 : i32
    %0 = arith.cmpi eq, %arg2, %c0_i32 : i32
    %1 = arith.extui %0 : i1 to i32
    %c0_i32_0 = arith.constant 0 : i32
    %2 = arith.cmpi ne, %1, %c0_i32_0 : i32
    scf.if %2 {
      %cst_10 = arith.constant 0.000000e+00 : f32
      %12 = vector.broadcast %cst_10 : f32 to vector<32x64xf32>
      %c0_11 = arith.constant 0 : index
      %c0_12 = arith.constant 0 : index
      %13 = vector.load %arg7[%c0_11, %c0_12] : memref<32x64xf32, #tpu.memory_space<vmem>>, vector<32x64xf32>
      tpu.vector_store %arg7[%c0_11, %c0_12], %12 {strides = array<i32>} : memref<32x64xf32, #tpu.memory_space<vmem>>, vector<32x64xf32>,
    } else {
    }
    %c0 = arith.constant 0 : index
    %c0_1 = arith.constant 0 : index
    %3 = vector.load %arg7[%c0, %c0_1] : memref<32x64xf32, #tpu.memory_space<vmem>>, vector<32x64xf32>
    %c0_2 = arith.constant 0 : index
    %c0_3 = arith.constant 0 : index
    %4 = vector.load %arg3[%c0_2, %c0_3] : memref<32x32xf32, #tpu.memory_space<vmem>>, vector<32x32xf32>
    %c0_4 = arith.constant 0 : index
    %c0_5 = arith.constant 0 : index
    %5 = vector.load %arg4[%c0_4, %c0_5] : memref<32x64xf32, #tpu.memory_space<vmem>>, vector<32x64xf32>
    %cst = arith.constant dense<0.000000e+00> : vector<32x64xf32>
    %6 = tpu.matmul %4, %5, %cst {dimension_numbers = #tpu.dot_dimension_numbers<[1], [0], [0], [1], [0, 0, 1, 1], [], []>} : vector<32x32xf32>, vector<32x64xf32>, vector<32x64xf32> -> vector<32x64xf32>
    %7 = arith.addf %3, %6 : vector<32x64xf32>
    %c0_6 = arith.constant 0 : index
    %c0_7 = arith.constant 0 : index
    %8 = vector.load %arg7[%c0_6, %c0_7] : memref<32x64xf32, #tpu.memory_space<vmem>>, vector<32x64xf32>
    tpu.vector_store %arg7[%c0_6, %c0_7], %7 {strides = array<i32>} : memref<32x64xf32, #tpu.memory_space<vmem>>, vector<32x64xf32>,
    %c0_i32_8 = arith.constant 0 : i32
    %9 = arith.cmpi eq, %arg2, %c0_i32_8 : i32
    %10 = arith.extui %9 : i1 to i32
    %c0_i32_9 = arith.constant 0 : i32
    %11 = arith.cmpi ne, %10, %c0_i32_9 : i32
    scf.if %11 {
      %c0_10 = arith.constant 0 : index
      %c0_11 = arith.constant 0 : index
      %12 = vector.load %arg7[%c0_10, %c0_11] : memref<32x64xf32, #tpu.memory_space<vmem>>, vector<32x64xf32>
      %c0_12 = arith.constant 0 : index
      %c0_13 = arith.constant 0 : index
      %13 = vector.load %arg5[%c0_12, %c0_13] : memref<1x64xf32, #tpu.memory_space<vmem>>, vector<1x64xf32>
      %14 = vector.broadcast %13 : vector<1x64xf32> to vector<32x64xf32>
      %15 = arith.addf %12, %14 : vector<32x64xf32>
      %c0_14 = arith.constant 0 : index
      %c0_15 = arith.constant 0 : index
      %16 = vector.load %arg6[%c0_14, %c0_15] : memref<32x64xf32, #tpu.memory_space<vmem>>, vector<32x64xf32>
      tpu.vector_store %arg6[%c0_14, %c0_15], %15 {strides = array<i32>} : memref<32x64xf32, #tpu.memory_space<vmem>>, vector<32x64xf32>,
    } else {
    }
    return
  }
  func.func @transform_0(%arg0: i32, %arg1: i32, %arg2: i32) -> (i32, i32) {
    %c0_i32 = arith.constant 0 : i32
    return %arg0, %arg2 : i32, i32
  }
  func.func @transform_1(%arg0: i32, %arg1: i32, %arg2: i32) -> (i32, i32) {
    %c0_i32 = arith.constant 0 : i32
    return %arg2, %arg1 : i32, i32
  }
  func.func @transform_2(%arg0: i32, %arg1: i32, %arg2: i32) -> (i32, i32) {
    %c0_i32 = arith.constant 0 : i32
    %c0_i32_0 = arith.constant 0 : i32
    return %c0_i32, %arg1 : i32, i32
  }
  func.func @transform_3(%arg0: i32, %arg1: i32, %arg2: i32) -> (i32, i32) {
    %c0_i32 = arith.constant 0 : i32
    return %arg0, %arg1 : i32, i32
  }
}

</mosaic_0001>

<bundles_post_ra>
// kernel: attention_knowledge_forward.2
= control target key start
LH: loop header
LB: loop body
LE: loop exit
PB: predicated region body
PF: predicated region fallthrough
CT: control target
= control target key end

     0   :  { %vm18_vm0 = vcmask 523264   ;;  %v127_v2 = vmov 0.0   ;;  %vm35_vm1 = vcmask 261120   ;;  %s199_s1 = inlined_call_operand.vmem [shape: f32[32,64], index: 1, kind: input, shape index: {}]   ;;  %s200_s2 = inlined_call_operand.vmem [shape: f32[1,64], index: 2, kind: input, shape index: {}]   ;;  %s201_s0 = inlined_call_operand.vmem [shape: f32[32,32], index: 0, kind: input, shape index: {}]   ;;  %s202_s3 = inlined_call_operand.vmem [shape: f32[32,64], index: 3, kind: output, shape index: {}]  }
   0x1   :  { %v34_v0 = vld [vmem:[%s199_s1 + $0x18] sm:$0xff]  ;;  %v33_v1 = vld [vmem:[%s199_s1 + $0x10] sm:$0xff]  ;;  %19 = vst.msk [vmem:[#allocation2] sm:$0xff] %vm18_vm0, %v127_v2  ;;  %v32_v3 = vld [vmem:[%s199_s1 + $0x8] sm:$0xff] }
   0x2   :  { %114 = vmatpush.msra.mxu2 %v34_v0  ;;  %115 = vmatpush.msra.mxu3 %v34_v0  ;;  %20 = vst.msk [vmem:[#allocation2 + $0x8] sm:$0xff] %vm18_vm0, %v127_v2  ;;  %v31_v4 = vld [vmem:[%s199_s1] sm:$0xff]  ;;  %v29_v5 = vld [vmem:[%s201_s0 + $0x10] sm:$0xff]  ;;  %v30_v6 = vld [vmem:[%s201_s0 + $0x18] sm:$0xff] }
   0x3   :  { %60 = vmatpush.msra.mxu0 %v34_v0  ;;  %113 = vmatpush.msra.mxu1 %v34_v0  ;;  %21 = vst.msk [vmem:[#allocation2 + $0x10] sm:$0xff] %vm18_vm0, %v127_v2  ;;  %v27_v7 = vld [vmem:[%s201_s0] sm:$0xff]  ;;  %v28_v8 = vld [vmem:[%s201_s0 + $0x8] sm:$0xff] }
   0x4   :  { %117 = vmatpush.msra.mxu2 %v33_v1  ;;  %118 = vmatpush.msra.mxu3 %v33_v1  ;;  %22 = vst.msk [vmem:[#allocation2 + $0x18] sm:$0xff] %vm18_vm0, %v127_v2  ;;  %v126_v21 = vld [vmem:[%s200_s2] ss:$0 sm:$0xff] }
   0x5   :  { %61 = vmatpush.msra.mxu0 %v33_v1  ;;  %116 = vmatpush.msra.mxu1 %v33_v1 }
   0x6   :  { %120 = vmatpush.msra.mxu2 %v32_v3  ;;  %121 = vmatpush.msra.mxu3 %v32_v3 }
   0x7   :  { %62 = vmatpush.msra.mxu0 %v32_v3  ;;  %119 = vmatpush.msra.mxu1 %v32_v3 }
   0x8   :  { %123 = vmatpush.msra.mxu2 %v31_v4  ;;  %124 = vmatpush.msra.mxu3 %v31_v4  ;;  %v23_v9 = vld [vmem:[#allocation2] sm:$0xff] }
   0x9   :  { %111 = vmatmul.msk.f32.vlgmr.msra.gmra.mxu2 %vm35_vm1, %v29_v5  ;;  %112 = vmatmul.msk.f32.vlgmr.msra.gmra.mxu3 %vm35_vm1, %v30_v6  ;;  %v24_v10 = vld [vmem:[#allocation2 + $0x8] sm:$0xff] }
   0xa   :  { %63 = vmatpush.msra.mxu0 %v31_v4  ;;  %122 = vmatpush.msra.mxu1 %v31_v4  ;;  %v25_v15 = vld [vmem:[#allocation2 + $0x10] sm:$0xff] }
   0xb   :  { %109 = vmatmul.msk.f32.vlgmr.msra.gmra.mxu0 %vm35_vm1, %v27_v7  ;;  %110 = vmatmul.msk.f32.vlgmr.msra.gmra.mxu1 %vm35_vm1, %v28_v8  ;;  %v26_v16 = vld [vmem:[#allocation2 + $0x18] sm:$0xff] }
  0x88   :  { %v65_v11 = vpop.f32.mrf.mxu0  ;;  %v68_v12 = vpop.f32.mrf.mxu1 }
  0x89   :  { %v77_v13 = vadd.f32 %v65_v11, %v23_v9  ;;  %v78_v14 = vadd.f32 %v68_v12, %v24_v10 }
  0x8b   :  { %82 = vst.msk [vmem:[#allocation2] sm:$0xff] %vm18_vm0, %v77_v13 }
  0x8c   :  { %83 = vst.msk [vmem:[#allocation2 + $0x8] sm:$0xff] %vm18_vm0, %v78_v14  ;;  %v71_v17 = vpop.f32.mrf.mxu2  ;;  %v74_v18 = vpop.f32.mrf.mxu3 }
  0x8d   :  { %v79_v19 = vadd.f32 %v71_v17, %v25_v15  ;;  %v80_v20 = vadd.f32 %v74_v18, %v26_v16 }
  0x8f   :  { %84 = vst.msk [vmem:[#allocation2 + $0x10] sm:$0xff] %vm18_vm0, %v79_v19 }
  0x90   :  { %85 = vst.msk [vmem:[#allocation2 + $0x18] sm:$0xff] %vm18_vm0, %v80_v20 }
  0x92   :  { %v89_v22 = vld [vmem:[#allocation2] sm:$0xff] }
  0x93   :  { %v97_v23 = vadd.f32 %v126_v21, %v89_v22  ;;  %v90_v24 = vld [vmem:[#allocation2 + $0x8] sm:$0xff] }
  0x94   :  { %v98_v25 = vadd.f32 %v126_v21, %v90_v24 }
  0x95   :  { %101 = vst.msk [vmem:[%s202_s3] sm:$0xff] %vm18_vm0, %v97_v23 }
  0x96   :  { %102 = vst.msk [vmem:[%s202_s3 + $0x8] sm:$0xff] %vm18_vm0, %v98_v25  ;;  %v91_v26 = vld [vmem:[#allocation2 + $0x10] sm:$0xff] }
  0x97   :  { %v99_v27 = vadd.f32 %v126_v21, %v91_v26  ;;  %v92_v28 = vld [vmem:[#allocation2 + $0x18] sm:$0xff] }
  0x98   :  { %v100_v29 = vadd.f32 %v126_v21, %v92_v28 }
  0x99   :  { %103 = vst.msk [vmem:[%s202_s3 + $0x10] sm:$0xff] %vm18_vm0, %v99_v27 }
  0x9a   :  { %104 = vst.msk [vmem:[%s202_s3 + $0x18] sm:$0xff] %vm18_vm0, %v100_v29 }

// kernel: attention_knowledge_forward.3
= control target key start
LH: loop header
LB: loop body
LE: loop exit
PB: predicated region body
PF: predicated region fallthrough
CT: control target
= control target key end

     0   :  { %9 = vsyncpa [#allocation6], 0  ;;  %s1395_s0 = inlined_call_operand.vmem [shape: f32[2,8,32], index: 0, kind: input, shape index: {}]   ;;  %s1396_s1 = inlined_call_operand.vmem [shape: f32[2,16,64], index: 1, kind: input, shape index: {}]   ;;  %s1397_s2 = inlined_call_operand.vmem [shape: f32[32,32], index: 2, kind: input, shape index: {}]   ;;  %s1398_s3 = inlined_call_operand.vmem [shape: f32[1,32], index: 3, kind: input, shape index: {}]   ;;  %s1399_s4 = inlined_call_operand.hbm [shape: f32[2,8,32], index: 4, kind: output, shape index: {}]  }
   0x1   :  { %11 = vsyncpa [#allocation6 + $0x1], 0  ;;  %s1183_s15 = smov 0   ;;  %s1185_s16 = smov 0  }
   0x2   :  { %s1187_s17 = smov 0   ;;  %s1189_s18 = smov 0  }
   0x3   :  { %s1191_s19 = smov 0   ;;  %s1193_s20 = smov 0  }
   0x4 LB: > { %s910_s21 = sadd.s32 4294967295, %s1140_s20   ;;  %s911_s22 = sadd.s32 4294967294, %s1140_s20   ;;  %s1140_s20 = sphi %s1193_s20, %s17_s20   ;;  %s1136_s19 = sphi %s1191_s19, %s1406_s19   ;;  %s1132_s18 = sphi %s1189_s18, %s1405_s18   ;;  %s1128_s17 = sphi %s1187_s17, %s1404_s17   ;;  %s1124_s16 = sphi %s1185_s16, %s1403_s16   ;;  %s1120_s15 = sphi %s1183_s15, %s1402_s15  }
   0x5   : > { %s36_s23 = sadd.s32 1, %s1136_s19  ;;  %s143_s24 = sadd.s32 1, %s1128_s17 }
   0x6   : > { %p38_p0 = scmp.ge.s32.totalorder %s36_s23, 2  ;;  %p153_p1 = scmp.ne.s32.totalorder %s1128_s17, %s1124_s16 }
   0x7   : > { %p154_p2 = scmp.eq.s32.totalorder %s910_s21, 1  ;;  %p159_p3 = scmp.ne.s32.totalorder %s1124_s16, %s1120_s15 }
   0x8   : > { %s1408_s23 = smov (%p38_p0, %s36_s23), 0  ;;  %p160_p5 = scmp.eq.s32.totalorder %s911_s22, 1 }
   0x9   : > { %p1223_p4 = por %p154_p2, %p153_p1  ;;  %s138_s26 = ssub.s32 %s1136_s19, %s1408_s23 }
   0xa   : > { %p914_p6 = scmp.ge.s32.totalorder %s1140_s20, 1  ;;  %p141_p7 = scmp.eq.s32.totalorder %s138_s26, 0 }
   0xb   : > { %p1230_p8 = por %p160_p5, %p159_p3  ;;  %p207_p9 = scmp.lt.s32.totalorder %s1140_s20, 3 }
   0xc   : > { %s1236_s28 = scalar_select %p141_p7, %s1128_s17, %s143_s24  }
   0xd   : > { %p208_p10 = pnand %p914_p6, %p207_p9 }
   0xe   : > { %p244_p11 = scmp.lt.s32.totalorder (!%p208_p10), %s1132_s18, 1  ;;  %s1142_s12 = smov (!%p208_p10), 120  }
   0xf   : > { %211 = sbr.rel (%p208_p10) target bundleno = 1222 (0x4c6), region = 36  ;;  %s1144_s13 = smov (!%p208_p10), 104  }
  0x10   : > { %s1147_s14 = smov (!%p208_p10), 96   ;;  %s1148_s21 = smov (!%p208_p10), 112  }
  0x11   : > { %s1150_s22 = smov (!%p208_p10), 88   ;;  %s1151_s24 = smov (!%p208_p10), 80  }
  0x12   : > { %s1152_s26 = smov (!%p208_p10), 72  }
  0x14   : > { %s245_s29 = scalar_select %p244_p11, %s1132_s18, 1  ;;  %vm274_vm0 = vcmask 64512   ;;  %vm265_vm1 = vcmask 31744   ;;  %v1143_v4 = vmov -inf   ;;  %vm305_vm2 = vcmask 130048  }
  0x15   : > { %266 = vst.msk [vmem:[#allocation2] sm:$0xff] %vm265_vm1, %v1143_v4  ;;  %v1145_v7 = vmov 0   ;;  %v1146_v8 = vmov 0.0   ;;  %vm327_vm3 = vcmask 7168   ;;  %v1149_v32 = vmov 1  }
  0x16   : > { %s940_s30 = sshll.u32 %s245_s29, 4  ;;  %s916_s5 = sshll.u32 %s245_s29, 3  ;;  %1012 = vset.pattern.permute.xlu1 %v1145_v7  ;;  %267 = vst.msk [vmem:[#allocation3] sm:$0xff] %vm265_vm1, %v1146_v8  ;;  %1018 = vset.pattern.permute.xlu2 %v1149_v32  ;;  %vm422_vm4 = vcmask 15368   ;;  %v1153_v42 = vmov 2   ;;  %v1154_v43 = vmov 3  }
  0x17   : > { %s259_s8 = scalar_lea.vmem %s1396_s1, %s940_s30  ;;  %s250_s11 = scalar_lea.vmem %s1395_s0, %s916_s5  ;;  %1030 = vset.pattern.permute.xlu0 %v1154_v43  ;;  %vm522_vm5 = vcmask 23568   ;;  %vm622_vm6 = vcmask 31768   ;;  %vm268_vm7 = vcmask 261120   ;;  %vm465_vm8 = vcmask 130112  }
  0x18   : > { %v273_v0 = vld [vmem:[%s259_s8 + $0x8] sm:$0xff]  ;;  %v270_v1 = vld [vmem:[%s250_s11] sm:$0xff]  ;;  %269 = vst.msk [vmem:[#allocation4] sm:$0xff] %vm268_vm7, %v1146_v8  ;;  %s1155_s29 = smov 8   ;;  %s1156_s30 = smov 16   ;;  %vm565_vm13 = vcmask 195712  }
  0x19   : > { %919 = vmatpush.xpose.msk.msra.mxu0 %vm274_vm0, %v273_v0  ;;  %v272_v2 = vld [vmem:[%s259_s8] sm:$0xff]  ;;  %v271_v3 = vmul.f32 0.35355338, %v270_v1  ;;  %s1157_s5 = smov 24   ;;  %vm665_vm14 = vcmask 261312  }
  0x1a   : > { %370 = vrot.lane.b32.xlu1 %v272_v2, %s1142_s12  ;;  %v1252_v9 = vpack.i.bf16 %v272_v2, %v273_v0 }
  0x1b   : > { %368 = vrot.lane.b32.xlu2 %v271_v3, %s1142_s12 }
  0x1c   : > { %v1255_v10 = vld [vmem:[#allocation2] sm:$0xff] }
  0x1d   : > { %920 = vmatpush.xpose.msk.msra.mxu0 %vm274_vm0, %v272_v2 }
  0x20   : > { %921 = vmatmul.msk.f32.vlgmr.msra.gmra.mxu0 %vm274_vm0, %v271_v3 }
  0x23   : > { %1014 = vrot.lane.b32.xlu2 %v1252_v9, %s1147_s14  ;;  %s241_s14 = sand.u32 1, %s1124_s16  }
  0x24   : > { %s802_s9 = scalar_lea.sflag [#allocation6], %s241_s14 }
  0x2b   : > { %470 = vrot.lane.b32.xlu2 %v272_v2, %s1148_s21 }
  0x33   : > { %572 = vrot.lane.b32.xlu2 %v273_v0, %s1144_s13 }
  0x75   : > { %v369_v16 = vpop.permute.xlu2 %368 }
  0x7d   : > { %v1015_v17 = vpop.permute.xlu2 %1014 }
  0x7e   : > { %v1016_v18 = vunpack.i.l.bf16 %v1015_v17  ;;  %v1017_v19 = vunpack.i.h.bf16 %v1015_v17 }
  0x80   : > { %359 = vmatpush.msra.mxu1 %v1016_v18 }
  0x82   : > { %360 = vmatpush.msra.mxu1 %v1017_v19 }
  0x85   : > { %v471_v20 = vpop.permute.xlu2 %470 }
  0x8c   : > { %v371_v15 = vpop.permute.xlu1 %370 }
  0x8d   : > { %v573_v21 = vpop.permute.xlu2 %572 }
  0x8e   : > { %931 = vmatpush.xpose.msk.msrb.mxu0 %vm274_vm0, %v573_v21 }
  0x9d   : > { %v301_v5 = vpop.f32.mrf.mxu0 }
  0x9e   : > { %v306_v6 = vsel %vm305_vm2, %v301_v5, -inf }
  0x9f   : > { %307 = vmax.xlane.f32.xlu0 %v306_v6 }
  0xb3   : > { %372 = vrot.lane.b32.xlu0 %v273_v0, %s1142_s12 }
  0xbb   : > { %570 = vrot.lane.b32.xlu0 %v272_v2, %s1144_s13 }
 0x112   : > { %v308_v11 = vpop.xlane.xlu0 %307 }
 0x113   : > { %v1258_v12 = vmax.f32 %v1255_v10, %v308_v11 }
 0x115   : > { %v310_v13 = vsub.f32 %v1255_v10, %v1258_v12  ;;  %367 = vst.msk [vmem:[#allocation2] sm:$0xff] %vm327_vm3, %v1258_v12  ;;  %315 = vperm.xlu1 %1012, %v1258_v12  }
 0x117   : > { %v311_v55 = vmul.f32 1.442695, %v310_v13 }
 0x11c   : > { %v1289_v38 = vld [vmem:[#allocation2] sm:$0xff] }
 0x11d   : > { %472 = vrot.lane.b32.xlu1 %v273_v0, %s1148_s21 }
 0x11e   : > { %1024 = vset.pattern.permute.xlu1 %v1153_v42 }
 0x125   : > { %v373_v14 = vpop.permute.xlu0 %372  ;;  %468 = vrot.lane.b32.xlu1 %v271_v3, %s1148_s21  ;;  %s915_s21 = sshll.u32 %s241_s14, 3 }
 0x126   : > { %923 = vmatpush.xpose.msk.msra.mxu2 %vm274_vm0, %v373_v14  ;;  %s243_s6 = scalar_lea.vmem [#allocation5], %s915_s21 }
 0x127   : > { %s815_s7 = sshll.u32 %s243_s6, 4  ;;  %s816_s7 = int_to_ptr.vmem [resolvable:$true] %s815_s7 }
 0x12a   : > { %924 = vmatpush.xpose.msk.msra.mxu2 %vm274_vm0, %v371_v15 }
 0x12d   : > { %925 = vmatmul.msk.f32.vlgmr.msra.gmra.mxu2 %vm274_vm0, %v369_v16  ;;  %568 = vrot.lane.b32.xlu1 %v271_v3, %s1144_s13  ;;  %v571_v22 = vpop.permute.xlu0 %570  ;;  %s1082_s13 = scalar_lea.hbm %s1399_s4, 16 }
 0x12e   : > { %932 = vmatpush.xpose.msk.msrb.mxu0 %vm274_vm0, %v571_v22 }
 0x187   : > { %v316_v23 = vpop.permute.xlu1 %315 }
 0x188   : > { %v318_v24 = vsub.f32 %v301_v5, %v316_v23 }
 0x18a   : > { %v319_v25 = vmul.f32 1.442695, %v318_v24 }
 0x18c   : > { %1044 = vpow2.f32 %v319_v25 }
 0x18f   : > { %v473_v26 = vpop.permute.xlu1 %472 }
 0x190   : > { %927 = vmatpush.xpose.msk.msrb.mxu1 %vm274_vm0, %v473_v26  ;;  %v321_v26 = vld [vmem:[#allocation3] sm:$0xff] }
 0x192   : > { %v1271_v27 = vpop.eup %1044 }
 0x193   : > { %922 = vmatmul.msk.f32.vlgmr.msra.gmra.mxu1 %vm305_vm2, %v1271_v27  ;;  %v323_v2 = vsel %vm305_vm2, %v1271_v27, 0.0 }
 0x194   : > { %928 = vmatpush.xpose.msk.msrb.mxu1 %vm274_vm0, %v471_v20 }
 0x197   : > { %v469_v28 = vpop.permute.xlu1 %468 }
 0x19b   : > { %929 = vmatmul.msk.f32.vlgmr.msrb.gmra.mxu1 %vm274_vm0, %v469_v28 }
 0x19f   : > { %v569_v29 = vpop.permute.xlu1 %568 }
 0x1a0   : > { %933 = vmatmul.msk.f32.vlgmr.msrb.gmra.mxu0 %vm274_vm0, %v569_v29 }
 0x1b0   : > { %v397_v30 = vpop.f32.mrf.mxu2 }
 0x1b1   : > { %v401_v31 = vsel %vm305_vm2, %v397_v30, -inf }
 0x1b2   : > { %402 = vmax.xlane.f32.xlu2 %v401_v31 }
 0x210   : > { %v1279_v33 = vpop.f32.mrf.mxu1 }
 0x218   : > { %v1281_v34 = vpop.f32.mrf.mxu1 }
 0x219   : > { %v501_v35 = vsel %vm305_vm2, %v1281_v34, -inf }
 0x21a   : > { %502 = vmax.xlane.f32.xlu0 %v501_v35 }
 0x21d   : > { %v1285_v36 = vpop.f32.mrf.mxu0 }
 0x21e   : > { %v601_v37 = vsel %vm305_vm2, %v1285_v36, -inf }
 0x21f   : > { %602 = vmax.xlane.f32.xlu1 %v601_v37 }
 0x225   : > { %v403_v39 = vpop.xlane.xlu2 %402 }
 0x226   : > { %v1292_v40 = vmax.f32 %v1289_v38, %v403_v39 }
 0x228   : > { %v405_v41 = vsub.f32 %v1289_v38, %v1292_v40  ;;  %467 = vst.msk [vmem:[#allocation2] sm:$0xff] %vm422_vm4, %v1292_v40  ;;  %410 = vperm.xlu2 %1018, %v1292_v40  }
 0x22a   : > { %v406_v23 = vmul.f32 1.442695, %v405_v41 }
 0x22e   : > { %1020 = vrot.lane.b32.xlu0 %v1252_v9, %s1150_s22  ;;  %s937_s22 = sshll.u32 %s1132_s18, 3 }
 0x22f   : > { %v500_v48 = vld [vmem:[#allocation2] sm:$0xff] }
 0x230   : > { %1026 = vrot.lane.b32.xlu2 %v1252_v9, %s1151_s24 }
 0x231   : > { %1036 = vset.pattern.permute.xlu2 %v1145_v7 }
 0x238   : > { %1032 = vrot.lane.b32.xlu2 %v1252_v9, %s1152_s26 }
 0x282   : > { %v411_v44 = vpop.permute.xlu2 %410 }
 0x283   : > { %v413_v45 = vsub.f32 %v397_v30, %v411_v44 }
 0x285   : > { %v414_v46 = vmul.f32 1.442695, %v413_v45 }
 0x287   : > { %1046 = vpow2.f32 %v414_v46 }
 0x288   : > { %1048 = vpow2.f32 %v311_v55 }
 0x28a   : > { %v1027_v3 = vpop.permute.xlu2 %1026 }
 0x28b   : > { %v1028_v4 = vunpack.i.l.bf16 %v1027_v3  ;;  %v1029_v5 = vunpack.i.h.bf16 %v1027_v3 }
 0x28d   : > { %v1047_v47 = vpop.eup %1046  ;;  %v503_v49 = vpop.xlane.xlu0 %502 }
 0x28e   : > { %v504_v50 = vmax.f32 %v500_v48, %v503_v49  ;;  %v418_v51 = vsel %vm305_vm2, %v1047_v47, 0.0  ;;  %v1049_v61 = vpop.eup %1048 }
 0x28f   : > { %419 = vadd.xlane.f32.xlu2 %v418_v51  ;;  %v322_v27 = vmul.f32 %v1049_v61, %v321_v26 }
 0x290   : > { %567 = vst.msk [vmem:[#allocation2] sm:$0xff] %vm522_vm5, %v504_v50  ;;  %510 = vperm.xlu1 %1024, %v504_v50   ;;  %v505_v57 = vsub.f32 %v500_v48, %v504_v50 }
 0x292   : > { %v603_v52 = vpop.xlane.xlu1 %602  ;;  %v506_v60 = vmul.f32 1.442695, %v505_v57  ;;  %v1033_v6 = vpop.permute.xlu2 %1032 }
 0x293   : > { %v1034_v9 = vunpack.i.l.bf16 %v1033_v6  ;;  %v1035_v10 = vunpack.i.h.bf16 %v1033_v6 }
 0x294   : > { %1050 = vpow2.f32 %v506_v60 }
 0x295   : > { %654 = vmatpush.msrb.mxu2 %v1034_v9 }
 0x297   : > { %v600_v53 = vld [vmem:[#allocation2] sm:$0xff]  ;;  %655 = vmatpush.msrb.mxu2 %v1035_v10 }
 0x298   : > { %v604_v54 = vmax.f32 %v600_v53, %v603_v52 }
 0x29a   : > { %667 = vst.msk [vmem:[#allocation2] sm:$0xff] %vm622_vm6, %v604_v54  ;;  %610 = vperm.xlu0 %1030, %v604_v54   ;;  %v605_v62 = vsub.f32 %v600_v53, %v604_v54  ;;  %v1051_v0 = vpop.eup %1050 }
 0x29c   : > { %v606_v63 = vmul.f32 1.442695, %v605_v62 }
 0x29e   : > { %1052 = vpow2.f32 %v606_v63 }
 0x2a0   : > { %v1021_v56 = vpop.permute.xlu0 %1020 }
 0x2a1   : > { %v1022_v58 = vunpack.i.l.bf16 %v1021_v56  ;;  %v1023_v59 = vunpack.i.h.bf16 %v1021_v56 }
 0x2a2   : > { %1037 = vset.pattern.permute.xlu0 %v1149_v32 }
 0x2a3   : > { %454 = vmatpush.msra.mxu3 %v1022_v58 }
 0x2a4   : > { %v1053_v1 = vpop.eup %1052 }
 0x2a5   : > { %455 = vmatpush.msra.mxu3 %v1023_v59 }
 0x2a6   : > { %926 = vmatmul.msk.f32.vlgmr.msra.gmra.mxu3 %vm305_vm2, %v1047_v47 }
 0x2a7   : > { %332 = vperm.xlu2 %1036, %v1049_v61   ;;  %554 = vmatpush.msrb.mxu3 %v1028_v4 }
 0x2a9   : > { %555 = vmatpush.msrb.mxu3 %v1029_v5 }
 0x2af   : > { %1038 = vset.pattern.permute.xlu2 %v1153_v42 }
 0x2b0   : > { %527 = vperm.xlu2 %1038, %v1051_v0  }
 0x2b8   : > { %1039 = vset.pattern.permute.xlu2 %v1154_v43 }
 0x2b9   : > { %627 = vperm.xlu2 %1039, %v1053_v1  }
 0x2ba   : > { %324 = vadd.xlane.f32.xlu1 %v323_v2 }
 0x2c1   : > { %1040 = vset.pattern.permute.xlu2 %v1145_v7  ;;  %v329_v7 = vld [vmem:[#allocation4] sm:$0xff] }
 0x302   : > { %v420_v11 = vpop.xlane.xlu2 %419  ;;  %v511_v12 = vpop.permute.xlu1 %510 }
 0x303   : > { %v513_v13 = vsub.f32 %v1281_v34, %v511_v12  ;;  %v770_v12 = vld [vmem:[%s1397_s2 + $0x10] sm:$0xff] }
 0x305   : > { %v514_v14 = vmul.f32 1.442695, %v513_v13  ;;  %v769_v13 = vld [vmem:[%s1397_s2 + $0x8] sm:$0xff] }
 0x307   : > { %1054 = vpow2.f32 %v514_v14  ;;  %v768_v14 = vld [vmem:[%s1397_s2] sm:$0xff] }
 0x30a   : > { %v333_v15 = vpop.permute.xlu2 %332 }
 0x30b   : > { %v335_v16 = vmul.f32 %v333_v15, %v329_v7 }
 0x30c   : > { %v611_v8 = vpop.permute.xlu0 %610 }
 0x30d   : > { %v1055_v17 = vpop.eup %1054  ;;  %v365_v18 = vadd.f32 %v1279_v33, %v335_v16  ;;  %v613_v19 = vsub.f32 %v1285_v36, %v611_v8 }
 0x30e   : > { %930 = vmatmul.msk.f32.vlgmr.msrb.gmra.mxu3 %vm305_vm2, %v1055_v17  ;;  %v518_v20 = vsel %vm305_vm2, %v1055_v17, 0.0 }
 0x30f   : > { %366 = vst.msk [vmem:[#allocation4] sm:$0xff] %vm274_vm0, %v365_v18  ;;  %v614_v21 = vmul.f32 1.442695, %v613_v19  ;;  %519 = vadd.xlane.f32.xlu0 %v518_v20 }
 0x311   : > { %1056 = vpow2.f32 %v614_v21 }
 0x312   : > { %1058 = vpow2.f32 %v406_v23  ;;  %v528_v62 = vpop.permute.xlu2 %527  ;;  %v1043_v23 = vld [vmem:[%s1398_s3] ss:$0 sm:$0xff] }
 0x316   : > { %v424_v49 = vld [vmem:[#allocation4] sm:$0xff] }
 0x317   : > { %v1057_v22 = vpop.eup %1056 }
 0x318   : > { %934 = vmatmul.msk.f32.vlgmr.msrb.gmra.mxu2 %vm305_vm2, %v1057_v22  ;;  %v618_v24 = vsel %vm305_vm2, %v1057_v22, 0.0  ;;  %v1059_v25 = vpop.eup %1058 }
 0x319   : > { %619 = vadd.xlane.f32.xlu1 %v618_v24 }
 0x31a   : > { %v628_v2 = vpop.permute.xlu2 %627 }
 0x323   : > { %427 = vperm.xlu0 %1037, %v1059_v25  }
 0x329   : > { %v457_v30 = vpop.f32.mrf.mxu3 }
 0x32d   : > { %v325_v28 = vpop.xlane.xlu1 %324 }
 0x32e   : > { %v326_v29 = vadd.f32 %v325_v28, %v322_v27 }
 0x330   : > { %328 = vst.msk [vmem:[#allocation3] sm:$0xff] %vm327_vm3, %v326_v29 }
 0x332   : > { %461 = vrot.lane.b32.xlu1 %v457_v30, %s1155_s29  ;;  %s813_s29 = scalar_lea.hbm %s1399_s4, %s937_s22 }
 0x333   : > { %s817_s8 = sshll.u32 %s813_s29, 4  ;;  %s818_s8 = int_to_ptr.hbm [resolvable:$true] %s817_s8 }
 0x334   : > { %s1076_s18 = sshra.s32 %s818_s8, 4  ;;  %s1077_s18 = int_to_ptr.hbm [resolvable:$true] %s1076_s18 }
 0x335   : > { %s1078_s10 = scalar_lea.hbm %s1077_s18, 8  ;;  %p1083_p1 = scmp.lt.s32.totalorder %s1077_s18, %s1399_s4 }
 0x336   : > { %p1079_p12 = scmp.ne.s32.totalorder %s1077_s18, %s1078_s10  ;;  %p1084_p2 = scmp.lt.s32.totalorder %s1082_s13, %s1078_s10 }
 0x337   : > { %v416_v31 = vld [vmem:[#allocation3] sm:$0xff] }
 0x338   : > { %v417_v32 = vmul.f32 %v1059_v25, %v416_v31  ;;  %p1080_p13 = pnand %p1079_p12, %p1223_p4  ;;  %p1085_p3 = por %p1084_p2, %p1083_p1 }
 0x33a   : > { %v421_v33 = vadd.f32 %v420_v11, %v417_v32  ;;  %v771_v11 = vld [vmem:[%s1397_s2 + $0x18] sm:$0xff]  ;;  %p1081_p0 = pneg %p1080_p13 }
 0x33b   : > { %792 = vmatpush.msra.mxu1 %v771_v11 }
 0x33c   : > { %423 = vst.msk [vmem:[#allocation3] sm:$0xff] %vm422_vm4, %v421_v33  ;;  %p1086_p5 = pnand %p1085_p3, %p1081_p0 }
 0x33d   : > { %793 = vmatpush.msra.mxu1 %v770_v12 }
 0x33f   : > { %794 = vmatpush.msra.mxu1 %v769_v13 }
 0x341   : > { %795 = vmatpush.msra.mxu1 %v768_v14 }
 0x343   : > { %v516_v34 = vld [vmem:[#allocation3] sm:$0xff] }
 0x344   : > { %v517_v35 = vmul.f32 %v1051_v0, %v516_v34 }
 0x382   : > { %v520_v36 = vpop.xlane.xlu0 %519 }
 0x383   : > { %v521_v37 = vadd.f32 %v520_v36, %v517_v35 }
 0x385   : > { %523 = vst.msk [vmem:[#allocation3] sm:$0xff] %vm522_vm5, %v521_v37 }
 0x38c   : > { %v616_v38 = vld [vmem:[#allocation3] sm:$0xff]  ;;  %v620_v40 = vpop.xlane.xlu1 %619 }
 0x38d   : > { %v617_v39 = vmul.f32 %v1053_v1, %v616_v38 }
 0x38f   : > { %v621_v41 = vadd.f32 %v620_v40, %v617_v39 }
 0x391   : > { %623 = vst.msk [vmem:[#allocation3] sm:$0xff] %vm622_vm6, %v621_v41  ;;  %v557_v42 = vpop.f32.mrf.mxu3 }
 0x392   : > { %561 = vrot.lane.b32.xlu1 %v557_v42, %s1156_s30 }
 0x395   : > { %v428_v47 = vpop.permute.xlu0 %427 }
 0x396   : > { %v430_v51 = vmul.f32 %v428_v47, %v424_v49 }
 0x398   : > { %v696_v44 = vld [vmem:[#allocation3] sm:$0xff] }
 0x399   : > { %1060 = vrcp.f32 %v696_v44  ;;  %v708_v52 = vand.u32 2147483648, %v696_v44  ;;  %v706_v55 = vand.u32 2147483647, %v696_v44  ;;  %vm702_vm10 = vweird.f32 %v696_v44 }
 0x39b   : > { %v657_v45 = vpop.f32.mrf.mxu2  ;;  %v709_v58 = vor.u32 1.1754944e-38, %v708_v52  ;;  %vm707_vm12 = vcmp.eq.f32.partialorder %v706_v55, 8.507059e+37 }
 0x39c   : > { %661 = vrot.lane.b32.xlu1 %v657_v45, %s1157_s5 }
 0x39f   : > { %v1061_v46 = vpop.eup %1060 }
 0x3a0   : > { %v698_v48 = vmul.f32 %v1061_v46, %v696_v44  ;;  %vm703_vm9 = vweird.f32 %v1061_v46 }
 0x3a1   : > { %vm704_vm11 = vmor %vm702_vm10, %vm703_vm9 }
 0x3a2   : > { %v699_v50 = vsub.f32 1.0, %v698_v48 }
 0x3a4   : > { %v462_v53 = vpop.permute.xlu1 %461  ;;  %v700_v54 = vmul.f32 %v1061_v46, %v699_v50 }
 0x3a5   : > { %v464_v56 = vadd.f32 %v462_v53, %v430_v51 }
 0x3a6   : > { %v701_v57 = vadd.f32 %v1061_v46, %v700_v54 }
 0x3a7   : > { %466 = vst.msk [vmem:[#allocation4] sm:$0xff] %vm465_vm8, %v464_v56 }
 0x3a8   : > { %v705_v59 = vsel %vm704_vm11, %v1061_v46, %v701_v57 }
 0x3a9   : > { %v710_v60 = vsel %vm707_vm12, %v709_v58, %v705_v59 }
 0x3aa   : > { %714 = vperm.xlu0 %1037, %v710_v60   ;;  %690 = vperm.xlu2 %1040, %v710_v60  }
 0x3ab   : > { %738 = vperm.xlu1 %1024, %v710_v60  }
 0x3ae   : > { %v524_v61 = vld [vmem:[#allocation4] sm:$0xff] }
 0x3af   : > { %v530_v63 = vmul.f32 %v528_v62, %v524_v61 }
 0x3b2   : > { %1041 = vset.pattern.permute.xlu2 %v1154_v43  ;;  %1042 = vset.pattern.permute.xlu0 %v1154_v43 }
 0x3b3   : > { %762 = vperm.xlu2 %1041, %v710_v60  }
 0x404   : > { %v562_v0 = vpop.permute.xlu1 %561  ;;  %v691_v9 = vpop.permute.xlu2 %690 }
 0x405   : > { %v564_v1 = vadd.f32 %v562_v0, %v530_v63 }
 0x407   : > { %566 = vst.msk [vmem:[#allocation4] sm:$0xff] %vm565_vm13, %v564_v1 }
 0x40d   : > { %v763_v19 = vpop.permute.xlu2 %762 }
 0x40e   : > { %v624_v3 = vld [vmem:[#allocation4] sm:$0xff]  ;;  %v662_v5 = vpop.permute.xlu1 %661 }
 0x40f   : > { %v630_v4 = vmul.f32 %v628_v2, %v624_v3 }
 0x411   : > { %v664_v6 = vadd.f32 %v662_v5, %v630_v4 }
 0x413   : > { %666 = vst.msk [vmem:[#allocation4] sm:$0xff] %vm665_vm14, %v664_v6 }
 0x41a   : > { %v671_v10 = vld [vmem:[#allocation4] sm:$0xff] }
 0x41b   : > { %v693_v43 = vmul.f32 %v691_v9, %v671_v10 }
 0x41c   : > { %v715_v7 = vpop.permute.xlu0 %714 }
 0x41d   : > { %694 = vst.msk [vmem:[#allocation4] sm:$0xff] %vm274_vm0, %v693_v43  ;;  %v739_v17 = vpop.permute.xlu1 %738 }
 0x424   : > { %v695_v15 = vld [vmem:[#allocation4] sm:$0xff] }
 0x425   : > { %v717_v16 = vmul.f32 %v715_v7, %v695_v15 }
 0x427   : > { %718 = vst.msk [vmem:[#allocation4] sm:$0xff] %vm465_vm8, %v717_v16 }
 0x42e   : > { %v719_v8 = vld [vmem:[#allocation4] sm:$0xff] }
 0x42f   : > { %v741_v18 = vmul.f32 %v739_v17, %v719_v8 }
 0x431   : > { %742 = vst.msk [vmem:[#allocation4] sm:$0xff] %vm565_vm13, %v741_v18 }
 0x438   : > { %v743_v20 = vld [vmem:[#allocation4] sm:$0xff] }
 0x439   : > { %v765_v21 = vmul.f32 %v763_v19, %v743_v20 }
 0x43b   : > { %766 = vst.msk [vmem:[#allocation4] sm:$0xff] %vm665_vm14, %v765_v21 }
 0x442   : > { %v767_v22 = vld [vmem:[#allocation4] sm:$0xff] }
 0x443   : > { %935 = vmatmul.msk.f32.vlgmr.msra.gmra.mxu1 %vm268_vm7, %v767_v22 }
 0x4c0   : > { %v797_v24 = vpop.f32.mrf.mxu1 }
 0x4c1   : > { %v798_v25 = vadd.f32 %v1043_v23, %v797_v24 }
 0x4c3   : > { %800 = vst.msk [vmem:[%s243_s6] sm:$0xff] %vm268_vm7, %v798_v25 }
 0x4c4   : > { %1089 = shalt.err (!%p1086_p5)
}
 0x4c5   : > { %941 = dma.vmem_to_hbm [thread:$0]  (%p1223_p4), %s816_s7, 128, %s818_s8, %s802_s9  }
 0x4c6 PF: > { %p947_p6 = scmp.ge.s32.totalorder %s1140_s20, 2  ;;  %s829_s14 = sand.u32 1, %s1120_s15  }
 0x4c7   : > { %s830_s24 = scalar_lea.sflag [#allocation6], %s829_s14 }
 0x4c8   : > { %p944_p7 = pnand %p947_p6, %p1230_p8 }
 0x4ca   : > { %p945_p9 = pneg %p944_p7 }
 0x4cc   : > { %1115 = dma.done.wait (%p945_p9), %s830_s24, 128  }
 0x4cd   : > { %1117 = vsyncadd (%p945_p9), %s830_s24, 4294967168  ;;  %s17_s20 = sadd.s32 1, %s1140_s20   ;;  %s1402_s15 = smov %s1124_s16 }
 0x4ce   : > { %p14_p10 = scmp.ge.s32.totalorder %s17_s20, 4   ;;  %s1403_s16 = smov %s1128_s17 }
 0x4cf   : > { %s1404_s17 = smov %s1236_s28  ;;  %s1405_s18 = smov %s1136_s19 }
 0x4d0   : > { %s1406_s19 = smov %s1408_s23  ;;  %16 = sbr.rel (!%p14_p10) target bundleno = 4 (0x4), region = 82 }
 0x4d5   :  { %836 = vsyncpa [#allocation6], 1 }
 0x4d6   :  { %838 = vsyncpa [#allocation6 + $0x1], 1 }

</bundles_post_ra>
